<compile_context>
chip_gen: v7x
topology: tpu7x:2x2x1
jax: 0.10.0
libtpu: 0.0.40
codegen_flags: <defaults>
</compile_context>

<pallas_src>
import functools

import jax
import jax.numpy as jnp
from jax import lax
from jax.experimental import pallas as pl
from jax.experimental.pallas import tpu as pltpu

LANE = 128


def _hsigmoid_head(s1, s2, w, bias, hw_true, out_dtype):
    """(sum, sum_sq) per (b, c) -> hsigmoid(conv1x1(mean * rsqrt(var + 1e-3)))."""
    mean = s1 * (1.0 / float(hw_true))
    if hw_true > 1:
        # torch.var default is UNBIASED: (sum(x^2) - sum(x)^2 / N) / (N - 1).
        var = (s2 - s1 * mean) * (1.0 / float(hw_true - 1))
        # Single-pass f32 moments can go slightly negative under cancellation;
        # torch's two-pass var is >= 0, so clamp for parity.
        var = jnp.maximum(var, 0.0)
    else:
        # Unbiased var of a single element is 0/0 -> NaN, matching torch.
        var = jnp.full_like(s1, jnp.nan)
    y = mean * lax.rsqrt(var + 0.001)
    # 1x1 conv on a 1x1 feature map == dense layer: y @ W + bias (MXU, f32 acc).
    z = jnp.dot(y, w, preferred_element_type=jnp.float32) + bias
    return (jnp.clip(z + 3.0, 0.0, 6.0) * (1.0 / 6.0)).astype(out_dtype)


def _single_step_kernel(x_ref, w_ref, b_ref, o_ref, *, hw_true):
    # Whole H*W extent in one block: no scratch, no mask, one XLU collapse.
    x = x_ref[...].astype(jnp.float32)
    s1 = jnp.sum(x, axis=-1)
    s2 = jnp.sum(x * x, axis=-1)
    o_ref[...] = _hsigmoid_head(s1, s2, w_ref[...], b_ref[...], hw_true, o_ref.dtype)


def _multi_step_kernel(x_ref, w_ref, b_ref, o_ref, s1_ref, s2_ref, *,
                       hw_true, hw_tile, num_hw_tiles, needs_mask):
    # x_ref: (bt, c, hw_tile) native dtype     w_ref: (c, k) f32
    # b_ref: (1, k) f32                        o_ref: (bt, k) f32
    # s1_ref, s2_ref: (bt, c, 128) f32 lane-shaped partial-sum accumulators
    j = pl.program_id(1)
    last = num_hw_tiles - 1

    @pl.when(j == 0)
    def _init():
        s1_ref[...] = jnp.zeros_like(s1_ref)
        s2_ref[...] = jnp.zeros_like(s2_ref)

    def _accumulate(tail):
        # Fold the hw_tile lanes 128 at a time with pure vreg-wise VPU adds.
        # Static 128-aligned ref slices never cross a (8,128) tile boundary.
        a1 = s1_ref[...]
        a2 = s2_ref[...]
        base = last * hw_tile          # static; only meaningful on the tail tile
        for t in range(hw_tile // LANE):
            lo = t * LANE
            if tail and base + lo >= hw_true:
                break                                      # chunk fully past true extent
            xc = x_ref[:, :, lo:lo + LANE].astype(jnp.float32)
            if tail and base + lo + LANE > hw_true:        # chunk straddles true extent
                pos = base + lo + lax.broadcasted_iota(jnp.int32, xc.shape, 2)
                xc = jnp.where(pos < hw_true, xc, 0.0)     # mask BEFORE squaring
            a1 = a1 + xc
            a2 = a2 + xc * xc
        s1_ref[...] = a1
        s2_ref[...] = a2

    if needs_mask:
        # Ragged H*W: only the last tile pays for iota/compare/select.
        @pl.when(j < last)
        def _full_tiles():
            _accumulate(False)

        @pl.when(j == last)
        def _tail_tile():
            _accumulate(True)
    else:
        _accumulate(False)

    @pl.when(j == last)
    def _finalize():
        s1 = jnp.sum(s1_ref[...], axis=-1)    # one cross-lane collapse per batch tile
        s2 = jnp.sum(s2_ref[...], axis=-1)
        o_ref[...] = _hsigmoid_head(s1, s2, w_ref[...], b_ref[...], hw_true, o_ref.dtype)


def _vmem_budget():
    """Generation-aware sizing. v5e/v6e: 128 MiB VMEM; v7x: 64 MiB/TC, 2 TCs."""
    try:
        phys = int(pltpu.get_tpu_info().vmem_capacity_bytes)
    except Exception:
        phys = 64 * 1024 * 1024               # conservative (v7x-sized) fallback
    two_tc = phys <= 80 * 1024 * 1024         # v7x heuristic: 64 MiB per TensorCore
    vmem_limit = min(phys * 3 // 4, 96 * 1024 * 1024)   # 96 MiB v5e/v6e, 48 MiB v7x
    return vmem_limit, two_tc


def attention_weights(x_nchw, weight_ck, bias_k=None, *, hw_tile=None, bt=None):
    """Returns f32 (b, k) == hsigmoid(Conv1x1(mean(x) * rsqrt(var_unbiased(x) + 1e-3))).

    x_nchw: (b, c, H, W) float (f32 or bf16; DMA'd in native dtype)
    weight_ck: (c, k)   (torch Conv2d weight (k, c, 1, 1) squeezed + transposed)
    bias_k: (k,) or None (attention_mode == 2: no bias)
    """
    b, c, H, W = x_nchw.shape
    k = weight_ck.shape[1]
    HW = H * W
    x_flat = x_nchw.reshape(b, c, HW)                  # native dtype; HW on lanes
    itemsize = jnp.dtype(x_flat.dtype).itemsize

    vmem_limit, two_tc = _vmem_budget()
    # Budget for the double-buffered x block + the two lane-shaped accumulators;
    # the rest of vmem_limit is left for weight/bias/output/slack.
    pipe_budget = vmem_limit // 2

    def fits(bt_, tile_):
        x_bytes = 2 * bt_ * c * tile_ * itemsize       # double-buffered input block
        acc_bytes = 2 * bt_ * c * LANE * 4             # s1 + s2 scratch
        return x_bytes + acc_bytes <= pipe_budget

    # ---- batch tile -------------------------------------------------------
    if bt is None:
        if b % 8 != 0:
            bt = b                                     # block dim == full array dim
        else:
            bt = 8
            if fits(bt, HW):
                # Single-HW-tile regime: grow bt (multiple of 8, divisor of b) to
                # amortize per-step overhead; keep >= 2 parallel batch tiles on
                # 2-TC (v7x) chips whenever the batch allows it.
                min_par = 2 if (two_tc and b >= 16) else 1
                for cand in range(b, 7, -8):
                    if b % cand == 0 and b // cand >= min_par and fits(cand, HW):
                        bt = cand
                        break
    assert b % bt == 0, "batch tile must divide the batch"
    num_b_tiles = b // bt

    # ---- HW tile ----------------------------------------------------------
    if hw_tile is None:
        if fits(bt, HW):
            hw_tile = HW                               # single tile == full array dim
        else:
            t = LANE                                   # largest pow2 multiple of 128 that fits
            while t * 2 < HW and fits(bt, t * 2):
                t *= 2
            hw_tile = t
    elif hw_tile >= HW:
        hw_tile = HW
    num_hw_tiles = pl.cdiv(HW, hw_tile)
    single_step = num_hw_tiles == 1
    if not single_step:
        assert hw_tile % LANE == 0, "hw_tile must be a multiple of 128"
    needs_mask = (HW % hw_tile) != 0

    weight = weight_ck.astype(jnp.float32)
    if bias_k is None:                                 # attention_mode == 2 (no bias)
        bias_k = jnp.zeros((k,), jnp.float32)
    bias_2d = bias_k.reshape(1, k).astype(jnp.float32)

    if single_step:
        kernel = functools.partial(_single_step_kernel, hw_true=HW)
        scratch_shapes = []
    else:
        kernel = functools.partial(
            _multi_step_kernel, hw_true=HW, hw_tile=hw_tile,
            num_hw_tiles=num_hw_tiles, needs_mask=needs_mask)
        scratch_shapes = [pltpu.VMEM((bt, c, LANE), jnp.float32),   # s1 partials
                          pltpu.VMEM((bt, c, LANE), jnp.float32)]   # s2 partials

    cost = pl.CostEstimate(
        flops=3 * b * c * HW + 2 * b * c * k,
        transcendentals=b * c,
        bytes_accessed=b * c * HW * itemsize + c * k * 4 + (b + 1) * k * 4,
    )

    return pl.pallas_call(
        kernel,
        out_shape=jax.ShapeDtypeStruct((b, k), jnp.float32),
        grid_spec=pltpu.PrefetchScalarGridSpec(
            num_scalar_prefetch=0,
            grid=(num_b_tiles, num_hw_tiles),
            in_specs=[
                pl.BlockSpec((bt, c, hw_tile), lambda i, j: (i, 0, j)),
                # Grid-invariant weight / bias: constant index map -> fetched once.
                # TODO(synk): pipeline_mode=pl.Buffered(1) would drop their second
                # VMEM buffer on v7x; omitted to keep lowering maximally portable.
                pl.BlockSpec((c, k), lambda i, j: (0, 0)),
                pl.BlockSpec((1, k), lambda i, j: (0, 0)),
            ],
            out_specs=pl.BlockSpec((bt, k), lambda i, j: (i, 0)),
            scratch_shapes=scratch_shapes,
        ),
        compiler_params=pltpu.CompilerParams(
            dimension_semantics=("parallel", "arbitrary"),
            vmem_limit_bytes=vmem_limit,
        ),
        cost_estimate=cost,
    )(x_flat, weight, bias_2d)


def _reference(x, w, bias):
    # pure-JAX reference (two-pass, f32) for sanity checking.
    xf = x.astype(jnp.float32)
    mean = jnp.mean(xf, axis=(2, 3))
    var = jnp.var(xf, axis=(2, 3), ddof=1)
    y = mean * lax.rsqrt(var + 0.001)
    z = y @ w.astype(jnp.float32) + bias.astype(jnp.float32)
    return jnp.clip(z + 3.0, 0.0, 6.0) / 6.0


if __name__ == "__main__":
    key = jax.random.PRNGKey(0)
    b, c, H, W, k = 2, 4, 16, 16, 8

    kx, kw, kb = jax.random.split(key, 3)
    x = jax.random.normal(kx, (b, c, H, W), dtype=jnp.float32)
    # deterministic "Conv2d(c, k, 1)" params: weight (k, c, 1, 1) -> stored as (c, k)
    weight = (jax.random.normal(kw, (k, c), dtype=jnp.float32) * 0.1).T  # (c, k)
    bias = jax.random.normal(kb, (k,), dtype=jnp.float32) * 0.1

    # 1) f32 input, single-HW-tile fast path.
    out = jax.block_until_ready(attention_weights(x, weight, bias))
    ref = _reference(x, weight, bias)
    assert out.shape == (b, k)
    assert jnp.allclose(out, ref, atol=1e-4, rtol=1e-4), (out, ref)

    # 2) bf16 input (native-dtype DMA path, widened to f32 in-kernel).
    x_bf16 = x.astype(jnp.bfloat16)
    out_bf16 = jax.block_until_ready(attention_weights(x_bf16, weight, bias))
    ref_bf16 = _reference(x_bf16, weight, bias)
    assert jnp.allclose(out_bf16, ref_bf16, atol=1e-3, rtol=1e-3), (out_bf16, ref_bf16)

    # 3) forced 128-lane tile on an even split (256 = 2*128): multi-step
    #    lane-shaped accumulator path, no tail mask.
    out_mt = jax.block_until_ready(attention_weights(x, weight, bias, hw_tile=128))
    assert jnp.allclose(out_mt, ref, atol=1e-4, rtol=1e-4), (out_mt, ref)

    # 4) ragged HW (169 = 13*13) with a forced 128-lane tile: multi-step
    #    accumulator + last-tile-only mask path.
    x_ragged = jax.random.normal(kx, (b, c, 13, 13), dtype=jnp.float32)
    out_r = jax.block_until_ready(
        attention_weights(x_ragged, weight, bias, hw_tile=128))
    ref_r = _reference(x_ragged, weight, bias)
    assert jnp.allclose(out_r, ref_r, atol=1e-4, rtol=1e-4), (out_r, ref_r)

    # 5) batch divisible by 8: exercises the grown batch tile / parallel grid axis.
    x_b16 = jax.random.normal(kx, (16, c, 8, 8), dtype=jnp.float32)
    out_b = jax.block_until_ready(attention_weights(x_b16, weight, bias))
    ref_b = _reference(x_b16, weight, bias)
    assert jnp.allclose(out_b, ref_b, atol=1e-4, rtol=1e-4), (out_b, ref_b)

    print("KERNEL_OK")
</pallas_src>

<mosaic_0001>
module attributes {stable_mosaic.version = 11 : i64} {
  func.func @_single_step_kernel(%arg0: i32, %arg1: i32, %arg2: memref<2x4x256xf32, #tpu.memory_space<vmem>>, %arg3: memref<4x8xf32, #tpu.memory_space<vmem>>, %arg4: memref<1x8xf32, #tpu.memory_space<vmem>>, %arg5: memref<2x8xf32, #tpu.memory_space<vmem>>) attributes {dimension_semantics = [#tpu.dimension_semantics<parallel>, #tpu.dimension_semantics<arbitrary>], iteration_bounds = array<i64: 1, 1>, scalar_prefetch = 0 : i64, scratch_operands = 0 : i64, tpu.core_type = #tpu.core_type<tc>, window_params = [{transform_indices = @transform_0, window_bounds = array<i64: 2, 4, 256>}, {pipeline_mode = #tpu.pipeline_mode<synchronous>, transform_indices = @transform_1, window_bounds = array<i64: 4, 8>}, {pipeline_mode = #tpu.pipeline_mode<synchronous>, transform_indices = @transform_2, window_bounds = array<i64: 1, 8>}, {transform_indices = @transform_3, window_bounds = array<i64: 2, 8>}]} {
    %c0 = arith.constant 0 : index
    %c0_0 = arith.constant 0 : index
    %c0_1 = arith.constant 0 : index
    %0 = vector.load %arg2[%c0, %c0_0, %c0_1] : memref<2x4x256xf32, #tpu.memory_space<vmem>>, vector<2x4x256xf32>
    %cst = arith.constant dense<0.000000e+00> : vector<2x4xf32>
    %1 = vector.multi_reduction <add>, %0, %cst [2] : vector<2x4x256xf32> to vector<2x4xf32>
    %2 = arith.mulf %0, %0 : vector<2x4x256xf32>
    %cst_2 = arith.constant dense<0.000000e+00> : vector<2x4xf32>
    %3 = vector.multi_reduction <add>, %2, %cst_2 [2] : vector<2x4x256xf32> to vector<2x4xf32>
    %c0_3 = arith.constant 0 : index
    %c0_4 = arith.constant 0 : index
    %4 = vector.load %arg3[%c0_3, %c0_4] : memref<4x8xf32, #tpu.memory_space<vmem>>, vector<4x8xf32>
    %c0_5 = arith.constant 0 : index
    %c0_6 = arith.constant 0 : index
    %5 = vector.load %arg4[%c0_5, %c0_6] : memref<1x8xf32, #tpu.memory_space<vmem>>, vector<1x8xf32>
    %cst_7 = arith.constant 3.906250e-03 : f32
    %6 = vector.broadcast %cst_7 : f32 to vector<2x4xf32>
    %7 = arith.mulf %1, %6 : vector<2x4xf32>
    %8 = arith.mulf %1, %7 : vector<2x4xf32>
    %9 = arith.subf %3, %8 : vector<2x4xf32>
    %cst_8 = arith.constant 0.00392156886 : f32
    %10 = vector.broadcast %cst_8 : f32 to vector<2x4xf32>
    %11 = arith.mulf %9, %10 : vector<2x4xf32>
    %cst_9 = arith.constant 0.000000e+00 : f32
    %12 = vector.broadcast %cst_9 : f32 to vector<2x4xf32>
    %13 = arith.maximumf %11, %12 : vector<2x4xf32>
    %cst_10 = arith.constant 1.000000e-03 : f32
    %14 = vector.broadcast %cst_10 : f32 to vector<2x4xf32>
    %15 = arith.addf %13, %14 : vector<2x4xf32>
    %16 = math.rsqrt %15 : vector<2x4xf32>
    %17 = arith.mulf %7, %16 : vector<2x4xf32>
    %cst_11 = arith.constant dense<0.000000e+00> : vector<2x8xf32>
    %18 = tpu.matmul %17, %4, %cst_11 {dimension_numbers = #tpu.dot_dimension_numbers<[1], [0], [0], [1], [0, 0, 1, 1], [], []>} : vector<2x4xf32>, vector<4x8xf32>, vector<2x8xf32> -> vector<2x8xf32>
    %19 = vector.broadcast %5 : vector<1x8xf32> to vector<2x8xf32>
    %20 = arith.addf %18, %19 : vector<2x8xf32>
    %cst_12 = arith.constant 3.000000e+00 : f32
    %21 = vector.broadcast %cst_12 : f32 to vector<2x8xf32>
    %22 = arith.addf %20, %21 : vector<2x8xf32>
    %cst_13 = arith.constant 0.000000e+00 : f32
    %cst_14 = arith.constant 6.000000e+00 : f32
    %23 = vector.broadcast %cst_13 : f32 to vector<2x8xf32>
    %24 = arith.maximumf %23, %22 : vector<2x8xf32>
    %25 = vector.broadcast %cst_14 : f32 to vector<2x8xf32>
    %26 = arith.minimumf %25, %24 : vector<2x8xf32>
    %cst_15 = arith.constant 0.166666672 : f32
    %27 = vector.broadcast %cst_15 : f32 to vector<2x8xf32>
    %28 = arith.mulf %26, %27 : vector<2x8xf32>
    %c0_16 = arith.constant 0 : index
    %c0_17 = arith.constant 0 : index
    %29 = vector.load %arg5[%c0_16, %c0_17] : memref<2x8xf32, #tpu.memory_space<vmem>>, vector<2x8xf32>
    tpu.vector_store %arg5[%c0_16, %c0_17], %28 {strides = array<i32>} : memref<2x8xf32, #tpu.memory_space<vmem>>, vector<2x8xf32>,
    return
  }
  func.func @transform_0(%arg0: i32, %arg1: i32) -> (i32, i32, i32) {
    %c0_i32 = arith.constant 0 : i32
    %c0_i32_0 = arith.constant 0 : i32
    return %arg0, %c0_i32, %arg1 : i32, i32, i32
  }
  func.func @transform_1(%arg0: i32, %arg1: i32) -> (i32, i32) {
    %c0_i32 = arith.constant 0 : i32
    %c0_i32_0 = arith.constant 0 : i32
    %c0_i32_1 = arith.constant 0 : i32
    return %c0_i32, %c0_i32_0 : i32, i32
  }
  func.func @transform_2(%arg0: i32, %arg1: i32) -> (i32, i32) {
    %c0_i32 = arith.constant 0 : i32
    %c0_i32_0 = arith.constant 0 : i32
    %c0_i32_1 = arith.constant 0 : i32
    return %c0_i32, %c0_i32_0 : i32, i32
  }
  func.func @transform_3(%arg0: i32, %arg1: i32) -> (i32, i32) {
    %c0_i32 = arith.constant 0 : i32
    %c0_i32_0 = arith.constant 0 : i32
    return %arg0, %c0_i32 : i32, i32
  }
}

</mosaic_0001>

<bundles_post_ra>
// kernel: tpu_custom_call.1
= control target key start
LH: loop header
LB: loop body
LE: loop exit
PB: predicated region body
PF: predicated region fallthrough
CT: control target
= control target key end

     0   :  { %8 = vsyncpa [#allocation3], 0  ;;  %s384_s0 = inlined_call_operand.hbm [shape: f32[2,4,256], index: 0, kind: input, shape index: {}]   ;;  %s385_s1 = inlined_call_operand.hbm [shape: f32[4,8], index: 1, kind: input, shape index: {}]   ;;  %s386_s2 = inlined_call_operand.vmem [shape: f32[1,8], index: 2, kind: input, shape index: {}]   ;;  %s387_s3 = inlined_call_operand.hbm [shape: f32[2,8], index: 3, kind: output, shape index: {}]  }
   0x1   :  { %9 = vsyncpa [#allocation6], 0 }
   0x2   :  { %10 = vsyncpa [#allocation4], 0  ;;  %s309_s12 = smov [#allocation2]   ;;  %s237_s16 = scalar_lea.hbm %s384_s0, 256 }
   0x3   :  { %s16_s13 = sshll.u32 %s309_s12, 4  ;;  %p238_p0 = scmp.ne.s32.totalorder %s384_s0, %s237_s16  ;;  %s17_s13 = int_to_ptr.vmem [resolvable:$true] %s16_s13 }
   0x4   :  { %p241_p1 = scmp.lt.u32.totalorder %s237_s16, %s384_s0 }
   0x6   :  { %p243_p2 = pnand %p241_p1, %p238_p0 }
   0x8   :  { %246 = shalt.err (!%p243_p2)
}
   0x9   :  { %s247_s21 = scalar_lea.vmem %s17_s13, 256  ;;  %p252_p4 = scmp.lt.s32.totalorder %s17_s13, %s17_s13 }
   0xa   :  { %p248_p3 = scmp.ne.s32.totalorder %s17_s13, %s247_s21  ;;  %p253_p5 = scmp.lt.s32.totalorder %s247_s21, %s247_s21 }
   0xc   :  { %p254_p6 = por %p253_p5, %p252_p4 }
   0xe   :  { %p255_p7 = pnand %p254_p6, %p248_p3 }
  0x10   :  { %258 = shalt.err (!%p255_p7)
}
  0x11   :  { %s310_s22 = smov 128   ;;  %s311_s23 = smov 8  }
  0x12   :  { %22 = dma.hbm_to_vmem [thread:$0]  %s384_s0, 256, %s17_s13, [#allocation3], %s310_s22, %s310_s22, %s311_s23  }
  0x13   :  { %s312_s26 = smov [#allocation5]   ;;  %s259_s30 = scalar_lea.hbm %s385_s1, 64 }
  0x14   :  { %s29_s27 = sshll.u32 %s312_s26, 4  ;;  %p260_p8 = scmp.ne.s32.totalorder %s385_s1, %s259_s30  ;;  %s30_s27 = int_to_ptr.vmem [resolvable:$true] %s29_s27 }
  0x15   :  { %p263_p9 = scmp.lt.u32.totalorder %s259_s30, %s385_s1 }
  0x17   :  { %p265_p10 = pnand %p263_p9, %p260_p8 }
  0x19   :  { %268 = shalt.err (!%p265_p10)
}
  0x1a   :  { %s269_s8 = scalar_lea.vmem %s30_s27, 64  ;;  %p274_p12 = scmp.lt.s32.totalorder %s30_s27, %s30_s27 }
  0x1b   :  { %p270_p11 = scmp.ne.s32.totalorder %s30_s27, %s269_s8  ;;  %p275_p13 = scmp.lt.s32.totalorder %s269_s8, %s269_s8 }
  0x1d   :  { %p276_p0 = por %p275_p13, %p274_p12 }
  0x1f   :  { %p277_p1 = pnand %p276_p0, %p270_p11 }
  0x21   :  { %280 = shalt.err (!%p277_p1)
}
  0x22   :  { %32 = dma.hbm_to_vmem [thread:$0]  %s385_s1, 64, %s30_s27, [#allocation6]  }
  0x23   :  { %303 = dma.done.wait [#allocation3], 256  }
  0x24   :  { %304 = vsyncadd [#allocation3], 4294967040 }
  0x25   :  { %305 = dma.done.wait [#allocation6], 64  }
  0x26   :  { %306 = vsyncadd [#allocation6], 4294967232  ;;  %vm49_vm0 = vcmask 1043456   ;;  %v41_v0 = vld [vmem:[#allocation2] sm:$0xff]  ;;  %v42_v1 = vld [vmem:[#allocation2 + $0x8] sm:$0xff]  ;;  %v313_v21 = vmov 0.0   ;;  %v104_v38 = vlaneseq }
  0x27   :  { %v45_v2 = vcombine.high %v41_v0, %v41_v0  ;;  %v50_v3 = vsel %vm49_vm0, %v41_v0, 0.0  ;;  %v60_v4 = vmul.f32 %v41_v0, %v41_v0  ;;  %v46_v5 = vcombine.high %v42_v1, %v42_v1  ;;  %v78_v20 = vld [vmem:[#allocation5] sm:$0xf]  ;;  %219 = vmatprep.subr.mxu0 %v313_v21  ;;  %v214_v49 = vld [vmem:[%s386_s2] ss:$0 sm:$0xff]  ;;  %s315_s11 = smov [#allocation7]  }
  0x28   :  { %v55_v6 = vsel %vm49_vm0, %v42_v1, 0.0  ;;  %v61_v7 = vmul.f32 %v42_v1, %v42_v1  ;;  %vm314_vm1 = vmmov 0   ;;  %220 = vmatpush3.msk.msra.mxu0 %vm49_vm0, %v78_v20  ;;  %v105_v39 = vand.u32 127, %v104_v38  ;;  %s204_s12 = sshll.u32 %s315_s11, 4  ;;  %s205_s12 = int_to_ptr.vmem [resolvable:$true] %s204_s12 }
  0x29   :  { %v51_v8 = vsel %vm49_vm0, %v45_v2, 0.0  ;;  %v64_v9 = vcombine.high %v60_v4, %v60_v4  ;;  %v68_v10 = vsel %vm49_vm0, %v60_v4, 0.0  ;;  %v56_v11 = vsel %vm49_vm0, %v46_v5, 0.0  ;;  %221 = vmatprep.mubr.msk.f32.mxu0 %vm314_vm1, %v313_v21  ;;  %s281_s13 = scalar_lea.vmem %s205_s12, 32  ;;  %p286_p3 = scmp.lt.s32.totalorder %s205_s12, %s205_s12 }
  0x2a   :  { %v52_v12 = vadd.f32 %v51_v8, %v50_v3  ;;  %v65_v13 = vcombine.high %v61_v7, %v61_v7  ;;  %v73_v15 = vsel %vm49_vm0, %v61_v7, 0.0  ;;  %v57_v17 = vadd.f32 %v56_v11, %v55_v6  ;;  %p282_p2 = scmp.ne.s32.totalorder %s205_s12, %s281_s13  ;;  %p287_p4 = scmp.lt.s32.totalorder %s281_s13, %s281_s13 }
  0x2b   :  { %v69_v14 = vsel %vm49_vm0, %v64_v9, 0.0  ;;  %v107_v40 = vshrl.u32 %v104_v38, 7  ;;  %vm114_vm2 = vcmask 1041409   ;;  %vm116_vm3 = vcmask 31744  }
  0x2c   :  { %53 = vadd.xlane.f32.xlu0 %v52_v12  ;;  %v70_v16 = vadd.f32 %v69_v14, %v68_v10  ;;  %v74_v18 = vsel %vm49_vm0, %v65_v13, 0.0  ;;  %vm196_vm4 = vcmask 58368   ;;  %p288_p5 = por %p287_p4, %p286_p3 }
  0x2d   :  { %v75_v19 = vadd.f32 %v74_v18, %v73_v15  ;;  %v108_v43 = vsub.s32 %v105_v39, %v107_v40 }
  0x2e   :  { %71 = vadd.xlane.f32.xlu1 %v70_v16  ;;  %p289_p6 = pnand %p288_p5, %p282_p2 }
  0x30   :  { %58 = vadd.xlane.f32.xlu0 %v57_v17 }
  0x32   :  { %76 = vadd.xlane.f32.xlu1 %v75_v19 }
  0xb9   :  { %v54_v22 = vpop.xlane.xlu0 %53 }
  0xba   :  { %v80_v23 = vmul.f32 0.00390625, %v54_v22 }
  0xbb   :  { %v72_v24 = vpop.xlane.xlu1 %71 }
  0xbc   :  { %v82_v25 = vmul.f32 %v80_v23, %v54_v22 }
  0xbd   :  { %v59_v26 = vpop.xlane.xlu0 %58 }
  0xbe   :  { %v84_v27 = vsub.f32 %v72_v24, %v82_v25  ;;  %v81_v28 = vmul.f32 0.00390625, %v59_v26 }
  0xbf   :  { %v77_v29 = vpop.xlane.xlu1 %76 }
  0xc0   :  { %v86_v30 = vmul.f32 0.003921569, %v84_v27  ;;  %v83_v31 = vmul.f32 %v81_v28, %v59_v26 }
  0xc2   :  { %v88_v32 = vmax.f32 %v86_v30, 0.0  ;;  %v85_v33 = vsub.f32 %v77_v29, %v83_v31 }
  0xc4   :  { %v90_v34 = vadd.f32 0.001, %v88_v32  ;;  %v87_v35 = vmul.f32 0.003921569, %v85_v33 }
  0xc6   :  { %233 = vrsqrt.f32 %v90_v34  ;;  %v89_v36 = vmax.f32 %v87_v35, 0.0 }
  0xc8   :  { %v91_v37 = vadd.f32 0.001, %v89_v36 }
  0xca   :  { %235 = vrsqrt.f32 %v91_v37 }
  0xd0   :  { %v234_v41 = vpop.eup %233 }
  0xd1   :  { %v94_v42 = vmul.f32 %v234_v41, %v80_v23 }
  0xd3   :  { %v109_v46 = vrot.slane %v94_v42, %v108_v43 }
  0xd4   :  { %v236_v44 = vpop.eup %235 }
  0xd5   :  { %v95_v45 = vmul.f32 %v236_v44, %v81_v28 }
  0xd7   :  { %v113_v47 = vrot.slane %v95_v45, %v108_v43 }
  0xd9   :  { %v115_v48 = vsel %vm114_vm2, %v113_v47, %v109_v46 }
  0xda   :  { %222 = vmatmul.mubr.msk.f32.vlgmr.msra.gmra.mrb[0].mxu0 %vm116_vm3, %v115_v48 }
 0x1ad   :  { %v188_v50 = vpop.f32.mrb[0].mxu0 }
 0x1ae   :  { %v189_v51 = vadd.f32 %v214_v49, %v188_v50  ;;  %v223_v52 = vpop.f32.mrb[1].mxu0 }
 0x1b0   :  { %v192_v53 = vadd.f32 3.0, %v189_v51 }
 0x1b2   :  { %v193_v54 = vmax.f32 %v192_v53, 0.0 }
 0x1b4   :  { %v194_v55 = vmin.f32 %v193_v54, 6.0 }
 0x1b6   :  { %v195_v56 = vmul.f32 0.16666667, %v194_v55 }
 0x1b8   :  { %197 = vst.msk [vmem:[#allocation7] sm:$0x3] %vm196_vm4, %v195_v56 }
 0x1b9   :  { %292 = shalt.err (!%p289_p6)
}
 0x1ba   :  { %s293_s15 = scalar_lea.hbm %s387_s3, 32 }
 0x1bb   :  { %p294_p7 = scmp.ne.s32.totalorder %s387_s3, %s293_s15  ;;  %p297_p8 = scmp.lt.u32.totalorder %s293_s15, %s387_s3 }
 0x1bd   :  { %p299_p9 = pnand %p297_p8, %p294_p7 }
 0x1bf   :  { %302 = shalt.err (!%p299_p9)
}
 0x1c0   :  { %207 = dma.vmem_to_hbm [thread:$0]  %s205_s12, 32, %s387_s3, [#allocation4]  }
 0x1c1   :  { %307 = dma.done.wait [#allocation4], 32  }
 0x1c2   :  { %308 = vsyncadd [#allocation4], 4294967264 }
 0x1c3   :  { %211 = vsyncpa [#allocation3], 1 }
 0x1c4   :  { %212 = vsyncpa [#allocation6], 1 }
 0x1c5   :  { %213 = vsyncpa [#allocation4], 1 }

</bundles_post_ra>
